<compile_context>
chip_gen: v7x
topology: tpu7x:2x2x1
jax: 0.10.0
libtpu: 0.0.40
codegen_flags: <defaults>
</compile_context>

<pallas_src>
import functools

import jax
import jax.numpy as jnp
from jax import lax
from jax.experimental import pallas as pl
from jax.experimental.pallas import tpu as pltpu


def _vmem_capacity_bytes():
    """Per-core VMEM capacity; conservative (v7x) fallback if query fails."""
    try:
        return int(pltpu.get_tpu_info().vmem_capacity_bytes)
    except Exception:
        return 64 * 1024 * 1024


def _const_spec(shape):
    """BlockSpec for a grid-invariant operand; single-buffered when supported."""
    nd = len(shape)

    def idx(i):
        return (0,) * nd

    try:
        return pl.BlockSpec(shape, idx, pipeline_mode=pl.Buffered(1))
    except (TypeError, AttributeError):
        return pl.BlockSpec(shape, idx)


def _patch_merge_kernel(x_ref, w_ref, b_ref, o_ref):
    """Fused 2x2 merge + LayerNorm(4C) + bias-free Linear(4C -> 2C).

    x_ref: (tn, 2, Wo, 2C)  two consecutive source image rows per output row;
           x_ref[:, 0] = [x0 | x2] (even source row), x_ref[:, 1] = [x1 | x3].
    w_ref: (4C, 2C) bf16    gamma-folded weight, rows in [x0|x2|x1|x3] order.
    b_ref: (1, 2C)  f32     beta @ w
    o_ref: (tn*Wo, 2C)      merged-token outputs
    """
    tn, _, wo, c2 = x_ref.shape
    m = tn * wo

    xb = x_ref[...]                                              # (tn, 2, Wo, 2C)
    v0 = xb[:, 0, :, :].reshape(m, c2).astype(jnp.float32)       # [x0 | x2]
    v1 = xb[:, 1, :, :].reshape(m, c2).astype(jnp.float32)       # [x1 | x3]

    # Lane-dense merged token (m, 4C): all LN/elementwise work runs on this.
    y = jnp.concatenate([v0, v1], axis=-1)

    inv_n = 1.0 / (2 * c2)                                       # 1 / (4C)
    mean = jnp.sum(y, axis=-1, keepdims=True) * inv_n
    d = y - mean
    var = jnp.sum(d * d, axis=-1, keepdims=True) * inv_n
    yn = (d * lax.rsqrt(var + 1e-5)).astype(w_ref.dtype)         # bf16 for MXU

    # One (m,4C)@(4C,2C) matmul; gamma already folded into w, beta into b.
    out = jnp.dot(yn, w_ref[...], preferred_element_type=jnp.float32)
    out = out + b_ref[...]
    o_ref[...] = out.astype(o_ref.dtype)


@functools.partial(jax.jit, static_argnames=("tn", "out_dtype"))
def patch_merging(x, gamma, beta, w, *, tn=None, out_dtype=None):
    """Forward pass of PatchMerging.

    x:     (B, H, W, C)  channels-last input
    gamma: (4C,)         LayerNorm weight
    beta:  (4C,)         LayerNorm bias
    w:     (4C, 2C)      reduction weight (== torch Linear.weight.T)
    returns (B, ceil(H/2), ceil(W/2), 2C)
    """
    B, H, W, C = x.shape

    # Pad odd spatial dims (matches F.pad(x, (0,0, 0,W%2, 0,H%2))).
    if (H % 2 == 1) or (W % 2 == 1):
        x = jnp.pad(x, ((0, 0), (0, H % 2), (0, W % 2), (0, 0)))
        _, H, W, _ = x.shape

    Ho, Wo = H // 2, W // 2
    N = B * Ho                     # output image rows
    C2, C4 = 2 * C, 4 * C
    M = N * Wo                     # merged tokens
    out_dtype = x.dtype if out_dtype is None else out_dtype

    # Free, contiguous view: (out-row, source-row-parity, out-col, [col-parity, chan]).
    xr = x.reshape(N, 2, Wo, C2)

    # Fold gamma into the weight and permute rows into the order the kernel
    # assembles channels ([x0 | x2 | x1 | x3]); fold beta into an output bias.
    wq = (gamma[:, None] * w).reshape(4, C, C2)           # quadrant order x0,x1,x2,x3
    w_perm = jnp.concatenate([wq[0], wq[2], wq[1], wq[3]], axis=0).astype(jnp.bfloat16)
    bias = (beta @ w).reshape(1, C2).astype(jnp.float32)

    vmem_cap = _vmem_capacity_bytes()
    if tn is None:
        # Per output-image-row footprint: double-buffered in/out pipeline
        # blocks plus ~4x the f32 input block of in-kernel temporaries
        # (y, d, yn, out, v0/v1). Keep the total at ~60% of physical VMEM.
        itm_x = jnp.dtype(x.dtype).itemsize
        itm_o = jnp.dtype(out_dtype).itemsize
        in_buf = Wo * C4 * itm_x
        out_buf = Wo * C2 * itm_o
        temps = 4 * Wo * C4 * 4
        per_row = 2 * in_buf + 2 * out_buf + temps
        budget = (vmem_cap * 3) // 5
        tn = max(1, budget // per_row)
        # >= 8 grid steps (>= 4 per TensorCore on v7x megacore) when N allows,
        # so per-core double-buffering overlaps DMA with compute.
        min_steps = min(N, 8)
        tn = min(tn, max(1, pl.cdiv(N, min_steps)))
        tn = min(tn, N)
    steps = pl.cdiv(N, tn)

    # <= 56 MiB on v7x (64 MiB physical), <= 96 MiB on v5e/v6e (128 MiB).
    vmem_limit = int(min(vmem_cap * 7 // 8, 96 * 1024 * 1024))

    out = pl.pallas_call(
        _patch_merge_kernel,
        out_shape=jax.ShapeDtypeStruct((M, C2), out_dtype),
        grid_spec=pltpu.PrefetchScalarGridSpec(
            num_scalar_prefetch=0,
            grid=(steps,),
            in_specs=[
                pl.BlockSpec((tn, 2, Wo, C2), lambda i: (i, 0, 0, 0)),
                _const_spec((C4, C2)),     # stacked gamma-folded weight
                _const_spec((1, C2)),      # beta @ w
            ],
            out_specs=pl.BlockSpec((tn * Wo, C2), lambda i: (i, 0)),
        ),
        compiler_params=pltpu.CompilerParams(
            dimension_semantics=("parallel",),
            vmem_limit_bytes=vmem_limit),
    )(xr, w_perm, bias)

    return out.reshape(B, Ho, Wo, C2)


def _reference(x, gamma, beta, w):
    """Pure-JAX f32 reference matching the PyTorch forward."""
    B, H, W, C = x.shape
    if (H % 2 == 1) or (W % 2 == 1):
        x = jnp.pad(x, ((0, 0), (0, H % 2), (0, W % 2), (0, 0)))
        _, H, W, _ = x.shape
    x0 = x[:, 0::2, 0::2, :]
    x1 = x[:, 1::2, 0::2, :]
    x2 = x[:, 0::2, 1::2, :]
    x3 = x[:, 1::2, 1::2, :]
    xm = jnp.concatenate([x0, x1, x2, x3], axis=-1)
    mean = jnp.mean(xm, axis=-1, keepdims=True)
    var = jnp.mean((xm - mean) ** 2, axis=-1, keepdims=True)
    xn = (xm - mean) * lax.rsqrt(var + 1e-5) * gamma + beta
    return jnp.einsum("bhwk,kn->bhwn", xn, w)


if __name__ == "__main__":
    # Small shapes consistent with the module: dim = C = 32 (so 4C = 128,
    # lane-friendly), batch = 2, spatial = 16.
    B, H, W, C = 2, 16, 16, 32
    key = jax.random.PRNGKey(0)
    kx, kg, kb, kw = jax.random.split(key, 4)

    x = jax.random.normal(kx, (B, H, W, C), dtype=jnp.float32)
    gamma = 1.0 + 0.1 * jax.random.normal(kg, (4 * C,), dtype=jnp.float32)
    beta = 0.1 * jax.random.normal(kb, (4 * C,), dtype=jnp.float32)
    # torch Linear.weight has shape (2*dim, 4*dim); we store its transpose.
    w = (jax.random.normal(kw, (4 * C, 2 * C), dtype=jnp.float32)
         / jnp.sqrt(4.0 * C))

    out = patch_merging(x, gamma, beta, w)
    out = jax.block_until_ready(out)

    ref = _reference(x, gamma, beta, w)
    assert out.shape == (B, H // 2, W // 2, 2 * C), out.shape
    # Tolerance reflects intentional bf16 MXU operands (f32 accumulation, f32
    # LayerNorm statistics) vs the pure-f32 reference.
    max_err = float(jnp.max(jnp.abs(out - ref)))
    assert max_err < 5e-2, max_err

    print("KERNEL_OK")
</pallas_src>

<mosaic_0001>
module attributes {stable_mosaic.version = 11 : i64} {
  func.func @_patch_merge_kernel(%arg0: i32, %arg1: memref<2x2x8x64xf32, #tpu.memory_space<vmem>>, %arg2: memref<128x64xbf16, #tpu.memory_space<vmem>>, %arg3: memref<1x64xf32, #tpu.memory_space<vmem>>, %arg4: memref<16x64xf32, #tpu.memory_space<vmem>>) attributes {dimension_semantics = [#tpu.dimension_semantics<parallel>], iteration_bounds = array<i64: 8>, scalar_prefetch = 0 : i64, scratch_operands = 0 : i64, tpu.core_type = #tpu.core_type<tc>, window_params = [{transform_indices = @transform_0, window_bounds = array<i64: 2, 2, 8, 64>}, {pipeline_mode = #tpu.pipeline_mode<synchronous>, transform_indices = @transform_1, window_bounds = array<i64: 128, 64>}, {pipeline_mode = #tpu.pipeline_mode<synchronous>, transform_indices = @transform_2, window_bounds = array<i64: 1, 64>}, {transform_indices = @transform_3, window_bounds = array<i64: 16, 64>}]} {
    %c0 = arith.constant 0 : index
    %c0_0 = arith.constant 0 : index
    %c0_1 = arith.constant 0 : index
    %c0_2 = arith.constant 0 : index
    %0 = vector.load %arg1[%c0, %c0_0, %c0_1, %c0_2] : memref<2x2x8x64xf32, #tpu.memory_space<vmem>>, vector<2x2x8x64xf32>
    %1 = vector.extract_strided_slice %0 {offsets = [0, 0, 0, 0], sizes = [2, 1, 8, 64], strides = [1, 1, 1, 1]} : vector<2x2x8x64xf32> to vector<2x1x8x64xf32>
    %2 = vector.shape_cast %1 : vector<2x1x8x64xf32> to vector<2x8x64xf32>
    %3 = vector.shape_cast %2 : vector<2x8x64xf32> to vector<16x64xf32>
    %4 = vector.extract_strided_slice %0 {offsets = [0, 1, 0, 0], sizes = [2, 1, 8, 64], strides = [1, 1, 1, 1]} : vector<2x2x8x64xf32> to vector<2x1x8x64xf32>
    %5 = vector.shape_cast %4 : vector<2x1x8x64xf32> to vector<2x8x64xf32>
    %6 = vector.shape_cast %5 : vector<2x8x64xf32> to vector<16x64xf32>
    %7 = tpu.concatenate %3, %6 in 1 : vector<16x64xf32>, vector<16x64xf32> -> vector<16x128xf32>
    %cst = arith.constant dense<0.000000e+00> : vector<16xf32>
    %8 = vector.multi_reduction <add>, %7, %cst [1] : vector<16x128xf32> to vector<16xf32>
    %9 = vector.shape_cast %8 : vector<16xf32> to vector<16x1xf32>
    %cst_3 = arith.constant 7.812500e-03 : f32
    %10 = vector.broadcast %cst_3 : f32 to vector<16x1xf32>
    %11 = arith.mulf %9, %10 : vector<16x1xf32>
    %12 = vector.broadcast %11 : vector<16x1xf32> to vector<16x128xf32>
    %13 = arith.subf %7, %12 : vector<16x128xf32>
    %14 = arith.mulf %13, %13 : vector<16x128xf32>
    %cst_4 = arith.constant dense<0.000000e+00> : vector<16xf32>
    %15 = vector.multi_reduction <add>, %14, %cst_4 [1] : vector<16x128xf32> to vector<16xf32>
    %16 = vector.shape_cast %15 : vector<16xf32> to vector<16x1xf32>
    %cst_5 = arith.constant 7.812500e-03 : f32
    %17 = vector.broadcast %cst_5 : f32 to vector<16x1xf32>
    %18 = arith.mulf %16, %17 : vector<16x1xf32>
    %cst_6 = arith.constant 9.99999974E-6 : f32
    %19 = vector.broadcast %cst_6 : f32 to vector<16x1xf32>
    %20 = arith.addf %18, %19 : vector<16x1xf32>
    %21 = math.rsqrt %20 : vector<16x1xf32>
    %22 = vector.broadcast %21 : vector<16x1xf32> to vector<16x128xf32>
    %23 = arith.mulf %13, %22 : vector<16x128xf32>
    %24 = arith.truncf %23 : vector<16x128xf32> to vector<16x128xbf16>
    %c0_7 = arith.constant 0 : index
    %c0_8 = arith.constant 0 : index
    %25 = vector.load %arg2[%c0_7, %c0_8] : memref<128x64xbf16, #tpu.memory_space<vmem>>, vector<128x64xbf16>
    %cst_9 = arith.constant dense<0.000000e+00> : vector<16x64xf32>
    %26 = tpu.matmul %24, %25, %cst_9 {dimension_numbers = #tpu.dot_dimension_numbers<[1], [0], [0], [1], [0, 0, 1, 1], [], []>} : vector<16x128xbf16>, vector<128x64xbf16>, vector<16x64xf32> -> vector<16x64xf32>
    %c0_10 = arith.constant 0 : index
    %c0_11 = arith.constant 0 : index
    %27 = vector.load %arg3[%c0_10, %c0_11] : memref<1x64xf32, #tpu.memory_space<vmem>>, vector<1x64xf32>
    %28 = vector.broadcast %27 : vector<1x64xf32> to vector<16x64xf32>
    %29 = arith.addf %26, %28 : vector<16x64xf32>
    %c0_12 = arith.constant 0 : index
    %c0_13 = arith.constant 0 : index
    %30 = vector.load %arg4[%c0_12, %c0_13] : memref<16x64xf32, #tpu.memory_space<vmem>>, vector<16x64xf32>
    tpu.vector_store %arg4[%c0_12, %c0_13], %29 {strides = array<i32>} : memref<16x64xf32, #tpu.memory_space<vmem>>, vector<16x64xf32>,
    return
  }
  func.func @transform_0(%arg0: i32) -> (i32, i32, i32, i32) {
    %c0_i32 = arith.constant 0 : i32
    %c0_i32_0 = arith.constant 0 : i32
    %c0_i32_1 = arith.constant 0 : i32
    %c0_i32_2 = arith.constant 0 : i32
    return %arg0, %c0_i32, %c0_i32_0, %c0_i32_1 : i32, i32, i32, i32
  }
  func.func @transform_1(%arg0: i32) -> (i32, i32) {
    %c0_i32 = arith.constant 0 : i32
    %c0_i32_0 = arith.constant 0 : i32
    %c0_i32_1 = arith.constant 0 : i32
    return %c0_i32, %c0_i32_0 : i32, i32
  }
  func.func @transform_2(%arg0: i32) -> (i32, i32) {
    %c0_i32 = arith.constant 0 : i32
    %c0_i32_0 = arith.constant 0 : i32
    %c0_i32_1 = arith.constant 0 : i32
    return %c0_i32, %c0_i32_0 : i32, i32
  }
  func.func @transform_3(%arg0: i32) -> (i32, i32) {
    %c0_i32 = arith.constant 0 : i32
    %c0_i32_0 = arith.constant 0 : i32
    return %arg0, %c0_i32 : i32, i32
  }
}

</mosaic_0001>

<bundles_post_ra>
// kernel: patch_merging.1
= control target key start
LH: loop header
LB: loop body
LE: loop exit
PB: predicated region body
PF: predicated region fallthrough
CT: control target
= control target key end

     0   :  { %8 = vsyncpa [#allocation3], 0  ;;  %s736_s0 = inlined_call_operand.vmem [shape: f32[16,2,8,64], index: 0, kind: input, shape index: {}]   ;;  %s737_s1 = inlined_call_operand.vmem [shape: bf16[128,64], index: 1, kind: input, shape index: {}]   ;;  %s738_s2 = inlined_call_operand.vmem [shape: f32[1,64], index: 2, kind: input, shape index: {}]   ;;  %s739_s3 = inlined_call_operand.hbm [shape: f32[128,64], index: 3, kind: output, shape index: {}]  }
   0x1   :  { %10 = vsyncpa [#allocation3 + $0x1], 0  ;;  %s603_s12 = smov 0   ;;  %s605_s13 = smov 0  }
   0x2   :  { %s607_s14 = smov 0   ;;  %s609_s15 = smov 0  }
   0x3 LB: > { %s624_s16 = sadd.s32 4294967295, %s575_s15   ;;  %s404_s17 = sadd.s32 4294967294, %s575_s15   ;;  %s575_s15 = sphi %s609_s15, %s745_s15   ;;  %s571_s14 = sphi %s607_s14, %s744_s14   ;;  %s567_s13 = sphi %s605_s13, %s743_s13   ;;  %s563_s12 = sphi %s603_s12, %s742_s12  }
   0x4   : > { %s628_s18 = sadd.s32 1, %s575_s15   ;;  %s91_s19 = sadd.s32 1, %s571_s14 }
   0x5   : > { %s88_s20 = ssub.s32 %s575_s15, %s628_s18  ;;  %p101_p0 = scmp.ne.s32.totalorder %s571_s14, %s567_s13 }
   0x6   : > { %p89_p1 = scmp.eq.s32.totalorder %s88_s20, 0  ;;  %p102_p2 = scmp.eq.s32.totalorder %s624_s16, 7 }
   0x7   : > { %p107_p3 = scmp.ne.s32.totalorder %s567_s13, %s563_s12  ;;  %p108_p4 = scmp.eq.s32.totalorder %s404_s17, 7 }
   0x8   : > { %s639_s21 = scalar_select %p89_p1, %s571_s14, %s91_s19  }
   0x9   : > { %p641_p5 = por %p102_p2, %p101_p0  ;;  %p645_p6 = por %p108_p4, %p107_p3 }
   0xa   : > { %p407_p7 = scmp.ge.s32.totalorder %s575_s15, 1  ;;  %p142_p8 = scmp.lt.s32.totalorder %s575_s15, 9 }
   0xc   : > { %p143_p9 = pnand %p407_p7, %p142_p8 }
   0xd   : > { %s409_s24 = sshll.u32 (!%p143_p9), %s624_s16, 1  ;;  %s577_s29 = smov (!%p143_p9), 64   ;;  %vm188_vm0 = vcmask (!%p143_p9), 523264   ;;  %v501_v8 = vld [vmem:[%s737_s1] sm:$0xff] (!%p143_p9)   ;;  %v578_v9 = vmov (!%p143_p9), 0.0   ;;  %v502_v10 = vld [vmem:[%s737_s1 + $0x8] sm:$0xff] (!%p143_p9)  }
   0xe   : > { %146 = sbr.rel (%p143_p9) target bundleno = 685 (0x2ad), region = 32  ;;  %p168_p10 = scmp.lt.s32.totalorder (!%p143_p9), %s409_s24, 15  ;;  %437 = vmatprep.subr.bf16.mxu0 (!%p143_p9), %v578_v9  ;;  %v503_v19 = vld [vmem:[%s737_s1 + $0x10] sm:$0xff] (!%p143_p9)   ;;  %v504_v20 = vld [vmem:[%s737_s1 + $0x18] sm:$0xff] (!%p143_p9)   ;;  %v505_v21 = vld [vmem:[%s737_s1 + $0x20] sm:$0xff] (!%p143_p9)   ;;  %vm579_vm1 = vmmov (!%p143_p9), 0  }
   0xf   : > { %438 = vmatpush3.bf16.msra.mxu0 (!%p143_p9), %v501_v8  ;;  %v506_v22 = vld [vmem:[%s737_s1 + $0x28] sm:$0xff] (!%p143_p9)   ;;  %453 = vmatprep.mubr.msk.bf16.mxu0 (!%p143_p9), %vm579_vm1, %v578_v9  ;;  %v507_v23 = vld [vmem:[%s737_s1 + $0x30] sm:$0xff] (!%p143_p9)   ;;  %v508_v24 = vld [vmem:[%s737_s1 + $0x38] sm:$0xff] (!%p143_p9)   ;;  %s427_s7 = sshll.u32 (!%p143_p9), %s624_s16, 8  ;;  %s580_s17 = smov (!%p143_p9), [#allocation2]  }
  0x10   : > { %439 = vmatprep.subr.bf16.mxu0 (!%p143_p9), %v578_v9  ;;  %v412_v36 = vld [vmem:[%s738_s2] ss:$0 sm:$0xff] (!%p143_p9)  ;;  %s691_s10 = scalar_lea.hbm (!%p143_p9), %s739_s3, %s427_s7  ;;  %s517_s19 = sshll.u32 (!%p143_p9), %s580_s17, 4  ;;  %s518_s19 = int_to_ptr.vmem [resolvable:$false] %s517_s19 }
  0x11   : > { %s519_s20 = scalar_lea.vmem (!%p143_p9), %s518_s19, 512 }
  0x13   : > { %440 = vmatpush3.bf16.msra.mxu0 (!%p143_p9), %v502_v10 }
  0x14   : > { %441 = vmatprep.subr.bf16.mxu0 (!%p143_p9), %v578_v9 }
  0x15   : > { %s747_s24 = smov (!%p168_p10, %s409_s24), 15 }
  0x16   : > { %s426_s25 = sshll.u32 %s747_s24, 4 }
  0x17   : > { %s172_s28 = scalar_lea.vmem %s736_s0, %s426_s25  ;;  %442 = vmatpush3.bf16.msra.mxu0 %v503_v19 }
  0x18   : > { %v177_v0 = vld [vmem:[%s172_s28 + $0x8] sm:$0xff]  ;;  %v179_v1 = vld [vmem:[%s172_s28 + $0x18] sm:$0xff]  ;;  %v176_v2 = vld [vmem:[%s172_s28] sm:$0xff]  ;;  %443 = vmatprep.subr.bf16.mxu0 %v578_v9 }
  0x19   : > { %182 = vrot.lane.b32.xlu0 %v177_v0, %s577_s29  ;;  %v178_v5 = vld [vmem:[%s172_s28 + $0x10] sm:$0xff]  ;;  %s164_s28 = sand.u32 1, %s567_s13  }
  0x1a   : > { %s695_s16 = scalar_lea.sflag [#allocation3], %s164_s28 }
  0x1b   : > { %444 = vmatpush3.bf16.msra.mxu0 %v504_v20 }
  0x1c   : > { %445 = vmatprep.subr.bf16.mxu0 %v578_v9 }
  0x1d   : > { %184 = vrot.lane.b32.xlu0 %v179_v1, %s577_s29  ;;  %s408_s29 = sshll.u32 %s164_s28, 4 }
  0x1e   : > { %s166_s5 = scalar_lea.vmem [#allocation2], %s408_s29 }
  0x1f   : > { %446 = vmatpush3.bf16.msra.mxu0 %v505_v21  ;;  %s342_s6 = sshll.u32 %s166_s5, 4  ;;  %s686_s6 = int_to_ptr.vmem [resolvable:$true] %s342_s6 }
  0x20   : > { %447 = vmatprep.subr.bf16.mxu0 %v578_v9  ;;  %s513_s11 = scalar_lea.vmem %s686_s6, 256  ;;  %p520_p0 = scmp.lt.s32.totalorder %s686_s6, %s518_s19 }
  0x21   : > { %p514_p11 = scmp.ne.s32.totalorder %s686_s6, %s513_s11  ;;  %p521_p1 = scmp.lt.s32.totalorder %s519_s20, %s513_s11 }
  0x23   : > { %448 = vmatpush3.bf16.msra.mxu0 %v506_v22  ;;  %p515_p12 = pnand %p514_p11, %p641_p5  ;;  %p522_p2 = por %p521_p1, %p520_p0 }
  0x24   : > { %449 = vmatprep.subr.bf16.mxu0 %v578_v9 }
  0x25   : > { %p516_p13 = pneg %p515_p12 }
  0x27   : > { %450 = vmatpush3.bf16.msra.mxu0 %v507_v23  ;;  %p523_p3 = pnand %p522_p2, %p516_p13 }
  0x28   : > { %451 = vmatprep.subr.bf16.mxu0 %v578_v9 }
  0x2b   : > { %452 = vmatpush3.bf16.msra.mxu0 %v508_v24 }
  0x8b   : > { %v183_v3 = vpop.permute.xlu0 %182 }
  0x8c   : > { %v189_v4 = vsel %vm188_vm0, %v176_v2, %v183_v3 }
  0x8d   : > { %191 = vadd.xlane.f32.xlu1 %v189_v4 }
  0x8f   : > { %v185_v6 = vpop.permute.xlu0 %184 }
  0x90   : > { %v190_v7 = vsel %vm188_vm0, %v178_v5, %v185_v6 }
  0x91   : > { %193 = vadd.xlane.f32.xlu1 %v190_v7 }
 0x11a   : > { %v192_v11 = vpop.xlane.xlu1 %191 }
 0x11b   : > { %v195_v12 = vmul.f32 0.0078125, %v192_v11 }
 0x11d   : > { %v197_v13 = vsub.f32 %v189_v4, %v195_v12 }
 0x11e   : > { %v194_v14 = vpop.xlane.xlu1 %193 }
 0x11f   : > { %v196_v15 = vmul.f32 0.0078125, %v194_v14  ;;  %v199_v16 = vmul.f32 %v197_v13, %v197_v13 }
 0x121   : > { %v198_v17 = vsub.f32 %v190_v7, %v196_v15  ;;  %201 = vadd.xlane.f32.xlu0 %v199_v16 }
 0x123   : > { %v200_v18 = vmul.f32 %v198_v17, %v198_v17 }
 0x125   : > { %203 = vadd.xlane.f32.xlu1 %v200_v18 }
 0x1ae   : > { %v202_v25 = vpop.xlane.xlu0 %201 }
 0x1af   : > { %v205_v26 = vmul.f32 0.0078125, %v202_v25 }
 0x1b1   : > { %v207_v27 = vadd.f32 1e-05, %v205_v26 }
 0x1b2   : > { %v204_v28 = vpop.xlane.xlu1 %203 }
 0x1b3   : > { %v206_v29 = vmul.f32 0.0078125, %v204_v28  ;;  %509 = vrsqrt.f32 %v207_v27 }
 0x1b5   : > { %v208_v30 = vadd.f32 1e-05, %v206_v29 }
 0x1b7   : > { %511 = vrsqrt.f32 %v208_v30 }
 0x1bd   : > { %v510_v31 = vpop.eup %509 }
 0x1be   : > { %v211_v33 = vmul.f32 %v510_v31, %v197_v13 }
 0x1c1   : > { %v512_v32 = vpop.eup %511 }
 0x1c2   : > { %v212_v34 = vmul.f32 %v512_v32, %v198_v17 }
 0x1c4   : > { %v213_v35 = vpack.c.bf16 %v212_v34, %v211_v33 }
 0x1c6   : > { %454 = vmatmul.mubr.bf16.vlgmr.msra.gmra.mrb[0].mxu0 %v213_v35 }
 0x299   : > { %v319_v37 = vpop.f32.mrb[0].mxu0 }
 0x29a   : > { %v320_v38 = vadd.f32 %v412_v36, %v319_v37  ;;  %v455_v39 = vpop.f32.mrb[1].mxu0 }
 0x29b   : > { %v322_v40 = vpop.f32.mrb[2].mxu0 }
 0x29c   : > { %326 = vst.msk [vmem:[%s166_s5] sm:$0xff] %vm188_vm0, %v320_v38  ;;  %v323_v41 = vadd.f32 %v412_v36, %v322_v40  ;;  %v456_v42 = vpop.f32.mrb[3].mxu0 }
 0x29e   : > { %327 = vst.msk [vmem:[%s166_s5 + $0x8] sm:$0xff] %vm188_vm0, %v323_v41 }
 0x29f   : > { %526 = shalt.err (!%p523_p3)
}
 0x2a0   : > { %s527_s24 = scalar_lea.hbm %s691_s10, 256  ;;  %s531_s27 = scalar_lea.hbm %s739_s3, 2048 }
 0x2a1   : > { %p528_p4 = scmp.ne.s32.totalorder %s691_s10, %s527_s24  ;;  %p532_p9 = scmp.lt.u32.totalorder %s691_s10, %s739_s3 }
 0x2a2   : > { %p533_p10 = scmp.lt.u32.totalorder %s531_s27, %s527_s24  ;;  %p535_p12 = scmp.lt.u32.totalorder %s527_s24, %s691_s10 }
 0x2a3   : > { %p529_p7 = pnand %p528_p4, %p641_p5 }
 0x2a4   : > { %p534_p11 = por %p533_p10, %p532_p9 }
 0x2a5   : > { %p530_p8 = pneg %p529_p7 }
 0x2a6   : > { %p536_p13 = por %p535_p12, %p534_p11 }
 0x2a8   : > { %p537_p0 = pnand %p536_p13, %p530_p8 }
 0x2aa   : > { %540 = shalt.err (!%p537_p0)
}
 0x2ab   : > { %s581_s30 = smov 128   ;;  %s582_s4 = smov 8  }
 0x2ac   : > { %457 = dma.vmem_to_hbm [thread:$0]  (%p641_p5), %s686_s6, 256, %s691_s10, %s695_s16, %s581_s30, %s581_s30, %s582_s4  }
 0x2ad PF: > { %p463_p1 = scmp.ge.s32.totalorder %s575_s15, 2  ;;  %s357_s5 = sand.u32 1, %s563_s12  }
 0x2ae   : > { %s358_s7 = scalar_lea.sflag [#allocation3], %s357_s5 }
 0x2af   : > { %p460_p2 = pnand %p463_p1, %p645_p6 }
 0x2b1   : > { %558 = dma.done.wait (!%p460_p2), %s358_s7, 256  }
 0x2b2   : > { %560 = vsyncadd (!%p460_p2), %s358_s7, 4294967040  ;;  %p13_p3 = scmp.ge.s32.totalorder %s628_s18, 10   ;;  %s742_s12 = smov %s567_s13 }
 0x2b3   : > { %s743_s13 = smov %s571_s14  ;;  %s744_s14 = smov %s639_s21 }
 0x2b4   : > { %s745_s15 = smov %s628_s18  ;;  %15 = sbr.rel (!%p13_p3) target bundleno = 3 (0x3), region = 67 }
 0x2bb   :  { %363 = vsyncpa [#allocation3], 1 }
 0x2bc   :  { %365 = vsyncpa [#allocation3 + $0x1], 1 }

</bundles_post_ra>
